<compile_context>
chip_gen: v6e
topology: v6e:2x2x1
jax: 0.10.0
libtpu: 0.0.40
codegen_flags: <defaults>
</compile_context>

<pallas_src>
import math

import jax
import jax.numpy as jnp
from jax import lax
from jax.experimental import pallas as pl
from jax.experimental.pallas import tpu as pltpu

EPS = 1e-6
CURVATURE = 0.05
CLIP_VALUE = 2.3                      # dead after F.normalize (||x|| == 1 <= 2.3)
SAFE_PROJ_THRESH = 1.0 - 0.001        # from HyperbolicOps.safe_proj


# --------------------------- in-kernel helpers --------------------------------

def _row_norm(x):
    # torch.norm(x, p=2, dim=-1, keepdim=True); padded columns are zero so the
    # norm over the padded width is exact.
    return jnp.sqrt(jnp.sum(x * x, axis=-1, keepdims=True))


def _atanh(x):
    # argument is clamped into [0, 1-EPS] before the call -> safe.
    return 0.5 * jnp.log((1.0 + x) / (1.0 - x))


def _exp_safe_log_factor(un, sqrt_c):
    """Combined per-row scalar factor for expmap0 -> safe_proj -> logmap0.

    Given a tangent vector u with row norm `un` ((rows,1) f32), the reference
    chain  logmap0(safe_proj(expmap0(u)))  equals  u * factor  with `factor`
    computed purely from `un`.  One cross-lane reduce (done by the caller);
    the rest is (rows,1) column math on the EUP/VPU.
    """
    th = jnp.tanh(sqrt_c * un)
    # expmap0 factor: tanh(sqrt_c*||u||) / (sqrt_c * max(||u||, EPS))
    e = th * pl.reciprocal(sqrt_c * jnp.maximum(un, EPS), approx=True)
    # ||expmap0(u)|| = tanh(sqrt_c*||u||) / sqrt_c
    on = th * (1.0 / sqrt_c)
    # safe_proj: rescale rows with norm > 0.999 down to 0.999
    p = jnp.minimum(1.0, SAFE_PROJ_THRESH *
                    pl.reciprocal(jnp.maximum(on, EPS), approx=True))
    onf = jnp.minimum(on, SAFE_PROJ_THRESH)        # norm after safe_proj
    # logmap0 factor: atanh(min(sqrt_c*n, 1-EPS)) / (sqrt_c * max(n, EPS))
    g = _atanh(jnp.minimum(sqrt_c * onf, 1.0 - EPS)) * pl.reciprocal(
        sqrt_c * jnp.maximum(onf, EPS), approx=True)
    return e * p * g


# ---------------------------------- kernel ------------------------------------

def hypcd_kernel(x_ref, bw_ref, bb_ref, pw1_ref, pb1_ref, pw2_ref, pb2_ref,
                 hw1_ref, hb1_ref, hw2_ref, hb2_ref, out_ref, acc_ref):
    f32 = jnp.float32
    bf16 = jnp.bfloat16
    sqrt_c = math.sqrt(CURVATURE)

    k = pl.program_id(1)
    nk = pl.num_programs(1)

    # ---- backbone (frozen linear stand-in for DINO ViT), K-tiled over in_dim --
    @pl.when(k == 0)
    def _():
        acc_ref[...] = jnp.zeros_like(acc_ref)

    acc_ref[...] += jnp.dot(x_ref[...], bw_ref[...], preferred_element_type=f32)

    # ---- everything after the reduction runs once, on the last K step --------
    @pl.when(k == nk - 1)
    def _():
        feats = acc_ref[...] + bb_ref[...]                       # f32

        # projector: Linear -> ReLU -> Linear (bf16 MXU, f32 accumulate)
        h = jnp.dot(feats.astype(bf16), pw1_ref[...], preferred_element_type=f32)
        h = jnp.maximum(h + pb1_ref[...], 0.0)
        proj = jnp.dot(h.astype(bf16), pw2_ref[...], preferred_element_type=f32)
        proj = proj + pb2_ref[...]

        # F.normalize(proj, p=2, dim=1)  (torch eps = 1e-12)      [reduce #1]
        # single EUP rsqrt on the squared norm (more precise than approx vrcp).
        sumsq = jnp.sum(proj * proj, axis=-1, keepdims=True)
        t1 = proj * lax.rsqrt(jnp.maximum(sumsq, 1e-24))

        # EuclideanToHyperbolic: FeatureClipper(2.3) is a no-op on unit-norm
        # rows, project() never fires (||expmap0|| < (1-EPS)/sqrt_c), and
        # expmap0 followed by layer1's logmap0 is the identity, so the
        # classifier consumes t1 directly.

        # classifier layer1: HyperbolicLinear(proj_dim -> 2*proj_dim)
        u1 = jnp.dot(t1.astype(bf16), hw1_ref[...], preferred_element_type=f32)
        u1 = u1 + hb1_ref[...]
        f1 = _exp_safe_log_factor(_row_norm(u1), sqrt_c)          # [reduce #2]
        # tangent-space ReLU; nn.Dropout(0.1) is identity at inference.
        # TODO(synk): train-mode stochastic dropout not reproduced.
        t2 = jnp.maximum(u1 * f1, 0.0)
        # expmap0(t2) followed by layer2's logmap0 is an exact round trip
        # (||t2|| << atanh(1-EPS)/sqrt_c) -> elided.

        # classifier layer2: HyperbolicLinear(2*proj_dim -> num_classes),
        # followed by HypCD's final logmap0 back to the tangent space.
        u2 = jnp.dot(t2.astype(bf16), hw2_ref[...], preferred_element_type=f32)
        u2 = u2 + hb2_ref[...]
        f2 = _exp_safe_log_factor(_row_norm(u2), sqrt_c)          # [reduce #3]
        out_ref[...] = (u2 * f2).astype(out_ref.dtype)


# --------------------------------- wrapper -------------------------------------

def _round_up(n, m):
    return ((n + m - 1) // m) * m


def hypcd_forward(x_nchw, params, *, tb=256, tk=512):
    """HypCD parametric forward pass. Returns (B, num_classes) f32 logits."""
    B = x_nchw.shape[0]
    x_flat = x_nchw.reshape(B, -1).astype(jnp.float32)
    in_dim = x_flat.shape[1]

    F_dim = params["bw"].shape[1]
    P = params["pw1"].shape[1]
    Hd = params["hw1"].shape[1]
    NC = params["hw2"].shape[1]

    # lane-dense padding: every feature width -> multiple of 128
    Fp = _round_up(F_dim, 128)
    Pp = _round_up(P, 128)
    Hp = _round_up(Hd, 128)
    NCp = _round_up(NC, 128)

    # batch tiling (multiple of 8 sublanes); pad instead of dropping remainder
    tb = max(8, min(tb, _round_up(B, 8)))
    Bp = _round_up(B, tb)

    # K (in_dim) tiling for the backbone matmul
    tk = min(tk, _round_up(in_dim, 128))
    Kp = _round_up(in_dim, tk)

    def pad2(a, rows, cols):
        return jnp.pad(a, ((0, rows - a.shape[0]), (0, cols - a.shape[1])))

    # bf16 MXU operands (weights + activations), f32 biases / accumulators.
    x_p = pad2(x_flat, Bp, Kp).astype(jnp.bfloat16)
    bw = pad2(params["bw"], Kp, Fp).astype(jnp.bfloat16)
    bb = pad2(params["bb"], 1, Fp).astype(jnp.float32)
    pw1 = pad2(params["pw1"], Fp, Pp).astype(jnp.bfloat16)
    pb1 = pad2(params["pb1"], 1, Pp).astype(jnp.float32)
    pw2 = pad2(params["pw2"], Pp, Pp).astype(jnp.bfloat16)
    pb2 = pad2(params["pb2"], 1, Pp).astype(jnp.float32)
    hw1 = pad2(params["hw1"], Pp, Hp).astype(jnp.bfloat16)
    hb1 = pad2(params["hb1"], 1, Hp).astype(jnp.float32)
    hw2 = pad2(params["hw2"], Hp, NCp).astype(jnp.bfloat16)
    hb2 = pad2(params["hb2"], 1, NCp).astype(jnp.float32)

    grid = (Bp // tb, Kp // tk)

    def const_spec(a):
        # invariant across the whole grid; the same block stays resident.
        return pl.BlockSpec(a.shape, lambda i, k: (0, 0))

    in_specs = [
        pl.BlockSpec((tb, tk), lambda i, k: (i, k)),   # x tile
        pl.BlockSpec((tk, Fp), lambda i, k: (k, 0)),   # backbone weight K-slice
        const_spec(bb), const_spec(pw1), const_spec(pb1), const_spec(pw2),
        const_spec(pb2), const_spec(hw1), const_spec(hb1), const_spec(hw2),
        const_spec(hb2),
    ]
    out_spec = pl.BlockSpec((tb, NCp), lambda i, k: (i, 0))  # constant across K

    fn = pl.pallas_call(
        hypcd_kernel,
        out_shape=jax.ShapeDtypeStruct((Bp, NCp), jnp.float32),
        grid=grid,
        in_specs=in_specs,
        out_specs=out_spec,
        scratch_shapes=[pltpu.VMEM((tb, Fp), jnp.float32)],
        compiler_params=pltpu.CompilerParams(
            dimension_semantics=("parallel", "arbitrary"),
            vmem_limit_bytes=32 * 1024 * 1024,   # generous; real use ~6 MiB
        ),
    )
    out_p = fn(x_p, bw, bb, pw1, pb1, pw2, pb2, hw1, hb1, hw2, hb2)
    return out_p[:B, :NC]


# ------------------------ pure-JAX f32 reference -------------------------------

def hypcd_reference(x_nchw, params):
    """Faithful f32 transcription of the PyTorch forward (full hyperbolic chain)."""
    c = CURVATURE
    sc = math.sqrt(c)

    def rnorm(v):
        return jnp.sqrt(jnp.sum(v * v, axis=-1, keepdims=True))

    def expmap0(v):
        n = rnorm(v)
        return jnp.tanh(sc * n) / (sc * jnp.maximum(n, EPS)) * v

    def logmap0(xh):
        n = rnorm(xh)
        return jnp.arctanh(jnp.minimum(sc * n, 1.0 - EPS)) / (sc * jnp.maximum(n, EPS)) * xh

    def project(xh):
        n = rnorm(xh)
        mx = (1.0 - EPS) / sc
        return jnp.where(n > mx, xh * mx / jnp.maximum(n, EPS), xh)

    def safe_proj(xh):
        n = rnorm(xh)
        thr = 1.0 - 0.001
        return jnp.where(n > thr, thr * xh / jnp.maximum(n, EPS), xh)

    def clip(xe):
        n = rnorm(xe)
        return jnp.where(n > CLIP_VALUE, CLIP_VALUE * xe / jnp.maximum(n, EPS), xe)

    B = x_nchw.shape[0]
    xf = x_nchw.reshape(B, -1).astype(jnp.float32)
    feats = xf @ params["bw"] + params["bb"]
    h = jnp.maximum(feats @ params["pw1"] + params["pb1"], 0.0)
    proj = h @ params["pw2"] + params["pb2"]
    t1 = proj / jnp.maximum(rnorm(proj), 1e-12)
    hyp = project(expmap0(clip(t1)))
    # classifier layer1
    u1 = logmap0(hyp) @ params["hw1"] + params["hb1"]
    o1 = safe_proj(expmap0(u1))
    # FFN tangent ReLU (+ identity dropout)
    xh = expmap0(jnp.maximum(logmap0(o1), 0.0))
    # classifier layer2
    u2 = logmap0(xh) @ params["hw2"] + params["hb2"]
    o2 = safe_proj(expmap0(u2))
    return logmap0(o2)


# ----------------------------------- main --------------------------------------

def _xavier_uniform(key, shape):
    fan_in, fan_out = shape
    bound = math.sqrt(6.0 / (fan_in + fan_out))
    return jax.random.uniform(key, shape, jnp.float32, -bound, bound)


def _bias_uniform(key, fan_in, dim):
    bound = 1.0 / math.sqrt(fan_in)
    return jax.random.uniform(key, (1, dim), jnp.float32, -bound, bound)


if __name__ == "__main__":
    B, C, H, W = 2, 4, 16, 16
    feature_dim, proj_dim, num_classes = 32, 16, 8
    in_dim = C * H * W

    key = jax.random.PRNGKey(0)
    ks = jax.random.split(key, 11)

    # TODO(synk): the real backbone is an external pretrained DINO ViT; it is
    # modeled here as a deterministic frozen linear layer (flatten -> feature_dim).
    params = {
        "bw":  _xavier_uniform(ks[0], (in_dim, feature_dim)),
        "bb":  _bias_uniform(ks[1], in_dim, feature_dim),
        "pw1": _xavier_uniform(ks[2], (feature_dim, proj_dim)),
        "pb1": _bias_uniform(ks[3], feature_dim, proj_dim),
        "pw2": _xavier_uniform(ks[4], (proj_dim, proj_dim)),
        "pb2": _bias_uniform(ks[5], proj_dim, proj_dim),
        "hw1": _xavier_uniform(ks[6], (proj_dim, 2 * proj_dim)),
        "hb1": _bias_uniform(ks[7], proj_dim, 2 * proj_dim),
        "hw2": _xavier_uniform(ks[8], (2 * proj_dim, num_classes)),
        "hb2": _bias_uniform(ks[9], 2 * proj_dim, num_classes),
    }

    x = jax.random.normal(ks[10], (B, C, H, W), jnp.float32)

    out = hypcd_forward(x, params)
    jax.block_until_ready(out)

    assert out.shape == (B, num_classes), out.shape
    assert bool(jnp.all(jnp.isfinite(out)))

    # loose tolerance: kernel matmuls run in bf16 on the MXU (f32 accumulate)
    ref = hypcd_reference(x, params)
    max_err = float(jnp.max(jnp.abs(out - ref)))
    assert max_err < 0.1, f"max abs error vs f32 reference = {max_err}"

    print("KERNEL_OK")
</pallas_src>

<mosaic_0001>
module attributes {stable_mosaic.version = 11 : i64} {
  func.func @hypcd_kernel(%arg0: i32, %arg1: i32, %arg2: memref<8x512xbf16, #tpu.memory_space<vmem>>, %arg3: memref<512x128xbf16, #tpu.memory_space<vmem>>, %arg4: memref<1x128xf32, #tpu.memory_space<vmem>>, %arg5: memref<128x128xbf16, #tpu.memory_space<vmem>>, %arg6: memref<1x128xf32, #tpu.memory_space<vmem>>, %arg7: memref<128x128xbf16, #tpu.memory_space<vmem>>, %arg8: memref<1x128xf32, #tpu.memory_space<vmem>>, %arg9: memref<128x128xbf16, #tpu.memory_space<vmem>>, %arg10: memref<1x128xf32, #tpu.memory_space<vmem>>, %arg11: memref<128x128xbf16, #tpu.memory_space<vmem>>, %arg12: memref<1x128xf32, #tpu.memory_space<vmem>>, %arg13: memref<8x128xf32, #tpu.memory_space<vmem>>, %arg14: memref<8x128xf32, #tpu.memory_space<vmem>>) attributes {dimension_semantics = [#tpu.dimension_semantics<parallel>, #tpu.dimension_semantics<arbitrary>], iteration_bounds = array<i64: 1, 2>, scalar_prefetch = 0 : i64, scratch_operands = 1 : i64, tpu.core_type = #tpu.core_type<tc>, window_params = [{transform_indices = @transform_0, window_bounds = array<i64: 8, 512>}, {transform_indices = @transform_1, window_bounds = array<i64: 512, 128>}, {pipeline_mode = #tpu.pipeline_mode<synchronous>, transform_indices = @transform_2, window_bounds = array<i64: 1, 128>}, {pipeline_mode = #tpu.pipeline_mode<synchronous>, transform_indices = @transform_3, window_bounds = array<i64: 128, 128>}, {pipeline_mode = #tpu.pipeline_mode<synchronous>, transform_indices = @transform_4, window_bounds = array<i64: 1, 128>}, {pipeline_mode = #tpu.pipeline_mode<synchronous>, transform_indices = @transform_5, window_bounds = array<i64: 128, 128>}, {pipeline_mode = #tpu.pipeline_mode<synchronous>, transform_indices = @transform_6, window_bounds = array<i64: 1, 128>}, {pipeline_mode = #tpu.pipeline_mode<synchronous>, transform_indices = @transform_7, window_bounds = array<i64: 128, 128>}, {pipeline_mode = #tpu.pipeline_mode<synchronous>, transform_indices = @transform_8, window_bounds = array<i64: 1, 128>}, {pipeline_mode = #tpu.pipeline_mode<synchronous>, transform_indices = @transform_9, window_bounds = array<i64: 128, 128>}, {pipeline_mode = #tpu.pipeline_mode<synchronous>, transform_indices = @transform_10, window_bounds = array<i64: 1, 128>}, {transform_indices = @transform_11, window_bounds = array<i64: 8, 128>}]} {
    %c0_i32 = arith.constant 0 : i32
    %0 = arith.cmpi eq, %arg1, %c0_i32 : i32
    %1 = arith.extui %0 : i1 to i32
    %c0_i32_0 = arith.constant 0 : i32
    %2 = arith.cmpi ne, %1, %c0_i32_0 : i32
    scf.if %2 {
      %cst_9 = arith.constant 0.000000e+00 : f32
      %12 = vector.broadcast %cst_9 : f32 to vector<8x128xf32>
      %c0_10 = arith.constant 0 : index
      %c0_11 = arith.constant 0 : index
      %13 = vector.load %arg14[%c0_10, %c0_11] : memref<8x128xf32, #tpu.memory_space<vmem>>, vector<8x128xf32>
      tpu.vector_store %arg14[%c0_10, %c0_11], %12 {strides = array<i32>} : memref<8x128xf32, #tpu.memory_space<vmem>>, vector<8x128xf32>,
    } else {
    }
    %c0 = arith.constant 0 : index
    %c0_1 = arith.constant 0 : index
    %3 = vector.load %arg14[%c0, %c0_1] : memref<8x128xf32, #tpu.memory_space<vmem>>, vector<8x128xf32>
    %c0_2 = arith.constant 0 : index
    %c0_3 = arith.constant 0 : index
    %4 = vector.load %arg2[%c0_2, %c0_3] : memref<8x512xbf16, #tpu.memory_space<vmem>>, vector<8x512xbf16>
    %c0_4 = arith.constant 0 : index
    %c0_5 = arith.constant 0 : index
    %5 = vector.load %arg3[%c0_4, %c0_5] : memref<512x128xbf16, #tpu.memory_space<vmem>>, vector<512x128xbf16>
    %cst = arith.constant dense<0.000000e+00> : vector<8x128xf32>
    %6 = tpu.matmul %4, %5, %cst {dimension_numbers = #tpu.dot_dimension_numbers<[1], [0], [0], [1], [0, 0, 1, 1], [], []>} : vector<8x512xbf16>, vector<512x128xbf16>, vector<8x128xf32> -> vector<8x128xf32>
    %7 = arith.addf %3, %6 : vector<8x128xf32>
    %c0_6 = arith.constant 0 : index
    %c0_7 = arith.constant 0 : index
    %8 = vector.load %arg14[%c0_6, %c0_7] : memref<8x128xf32, #tpu.memory_space<vmem>>, vector<8x128xf32>
    tpu.vector_store %arg14[%c0_6, %c0_7], %7 {strides = array<i32>} : memref<8x128xf32, #tpu.memory_space<vmem>>, vector<8x128xf32>,
    %c1_i32 = arith.constant 1 : i32
    %9 = arith.cmpi eq, %arg1, %c1_i32 : i32
    %10 = arith.extui %9 : i1 to i32
    %c0_i32_8 = arith.constant 0 : i32
    %11 = arith.cmpi ne, %10, %c0_i32_8 : i32
    scf.if %11 {
      %c0_9 = arith.constant 0 : index
      %c0_10 = arith.constant 0 : index
      %12 = vector.load %arg14[%c0_9, %c0_10] : memref<8x128xf32, #tpu.memory_space<vmem>>, vector<8x128xf32>
      %c0_11 = arith.constant 0 : index
      %c0_12 = arith.constant 0 : index
      %13 = vector.load %arg4[%c0_11, %c0_12] : memref<1x128xf32, #tpu.memory_space<vmem>>, vector<1x128xf32>
      %14 = vector.broadcast %13 : vector<1x128xf32> to vector<8x128xf32>
      %15 = arith.addf %12, %14 : vector<8x128xf32>
      %16 = arith.truncf %15 : vector<8x128xf32> to vector<8x128xbf16>
      %c0_13 = arith.constant 0 : index
      %c0_14 = arith.constant 0 : index
      %17 = vector.load %arg5[%c0_13, %c0_14] : memref<128x128xbf16, #tpu.memory_space<vmem>>, vector<128x128xbf16>
      %cst_15 = arith.constant dense<0.000000e+00> : vector<8x128xf32>
      %18 = tpu.matmul %16, %17, %cst_15 {dimension_numbers = #tpu.dot_dimension_numbers<[1], [0], [0], [1], [0, 0, 1, 1], [], []>} : vector<8x128xbf16>, vector<128x128xbf16>, vector<8x128xf32> -> vector<8x128xf32>
      %c0_16 = arith.constant 0 : index
      %c0_17 = arith.constant 0 : index
      %19 = vector.load %arg6[%c0_16, %c0_17] : memref<1x128xf32, #tpu.memory_space<vmem>>, vector<1x128xf32>
      %20 = vector.broadcast %19 : vector<1x128xf32> to vector<8x128xf32>
      %21 = arith.addf %18, %20 : vector<8x128xf32>
      %cst_18 = arith.constant 0.000000e+00 : f32
      %22 = vector.broadcast %cst_18 : f32 to vector<8x128xf32>
      %23 = arith.maximumf %21, %22 : vector<8x128xf32>
      %24 = arith.truncf %23 : vector<8x128xf32> to vector<8x128xbf16>
      %c0_19 = arith.constant 0 : index
      %c0_20 = arith.constant 0 : index
      %25 = vector.load %arg7[%c0_19, %c0_20] : memref<128x128xbf16, #tpu.memory_space<vmem>>, vector<128x128xbf16>
      %cst_21 = arith.constant dense<0.000000e+00> : vector<8x128xf32>
      %26 = tpu.matmul %24, %25, %cst_21 {dimension_numbers = #tpu.dot_dimension_numbers<[1], [0], [0], [1], [0, 0, 1, 1], [], []>} : vector<8x128xbf16>, vector<128x128xbf16>, vector<8x128xf32> -> vector<8x128xf32>
      %c0_22 = arith.constant 0 : index
      %c0_23 = arith.constant 0 : index
      %27 = vector.load %arg8[%c0_22, %c0_23] : memref<1x128xf32, #tpu.memory_space<vmem>>, vector<1x128xf32>
      %28 = vector.broadcast %27 : vector<1x128xf32> to vector<8x128xf32>
      %29 = arith.addf %26, %28 : vector<8x128xf32>
      %30 = arith.mulf %29, %29 : vector<8x128xf32>
      %cst_24 = arith.constant dense<0.000000e+00> : vector<8xf32>
      %31 = vector.multi_reduction <add>, %30, %cst_24 [1] : vector<8x128xf32> to vector<8xf32>
      %32 = vector.shape_cast %31 : vector<8xf32> to vector<8x1xf32>
      %cst_25 = arith.constant 1.000000e-24 : f32
      %33 = vector.broadcast %cst_25 : f32 to vector<8x1xf32>
      %34 = arith.maximumf %32, %33 : vector<8x1xf32>
      %35 = math.rsqrt %34 : vector<8x1xf32>
      %36 = vector.broadcast %35 : vector<8x1xf32> to vector<8x128xf32>
      %37 = arith.mulf %29, %36 : vector<8x128xf32>
      %38 = arith.truncf %37 : vector<8x128xf32> to vector<8x128xbf16>
      %c0_26 = arith.constant 0 : index
      %c0_27 = arith.constant 0 : index
      %39 = vector.load %arg9[%c0_26, %c0_27] : memref<128x128xbf16, #tpu.memory_space<vmem>>, vector<128x128xbf16>
      %cst_28 = arith.constant dense<0.000000e+00> : vector<8x128xf32>
      %40 = tpu.matmul %38, %39, %cst_28 {dimension_numbers = #tpu.dot_dimension_numbers<[1], [0], [0], [1], [0, 0, 1, 1], [], []>} : vector<8x128xbf16>, vector<128x128xbf16>, vector<8x128xf32> -> vector<8x128xf32>
      %c0_29 = arith.constant 0 : index
      %c0_30 = arith.constant 0 : index
      %41 = vector.load %arg10[%c0_29, %c0_30] : memref<1x128xf32, #tpu.memory_space<vmem>>, vector<1x128xf32>
      %42 = vector.broadcast %41 : vector<1x128xf32> to vector<8x128xf32>
      %43 = arith.addf %40, %42 : vector<8x128xf32>
      %44 = arith.mulf %43, %43 : vector<8x128xf32>
      %cst_31 = arith.constant dense<0.000000e+00> : vector<8xf32>
      %45 = vector.multi_reduction <add>, %44, %cst_31 [1] : vector<8x128xf32> to vector<8xf32>
      %46 = vector.shape_cast %45 : vector<8xf32> to vector<8x1xf32>
      %47 = math.sqrt %46 : vector<8x1xf32>
      %cst_32 = arith.constant 0.223606795 : f32
      %48 = vector.broadcast %cst_32 : f32 to vector<8x1xf32>
      %49 = arith.mulf %48, %47 : vector<8x1xf32>
      %50 = math.tanh %49 : vector<8x1xf32>
      %cst_33 = arith.constant 9.99999997E-7 : f32
      %51 = vector.broadcast %cst_33 : f32 to vector<8x1xf32>
      %52 = arith.maximumf %47, %51 : vector<8x1xf32>
      %cst_34 = arith.constant 0.223606795 : f32
      %53 = vector.broadcast %cst_34 : f32 to vector<8x1xf32>
      %54 = arith.mulf %53, %52 : vector<8x1xf32>
      %55 = tpu.reciprocal %54 {approx = true} : vector<8x1xf32> -> vector<8x1xf32>
      %56 = arith.mulf %50, %55 : vector<8x1xf32>
      %cst_35 = arith.constant 4.47213602 : f32
      %57 = vector.broadcast %cst_35 : f32 to vector<8x1xf32>
      %58 = arith.mulf %50, %57 : vector<8x1xf32>
      %cst_36 = arith.constant 9.99999997E-7 : f32
      %59 = vector.broadcast %cst_36 : f32 to vector<8x1xf32>
      %60 = arith.maximumf %58, %59 : vector<8x1xf32>
      %61 = tpu.reciprocal %60 {approx = true} : vector<8x1xf32> -> vector<8x1xf32>
      %cst_37 = arith.constant 9.990000e-01 : f32
      %62 = vector.broadcast %cst_37 : f32 to vector<8x1xf32>
      %63 = arith.mulf %62, %61 : vector<8x1xf32>
      %cst_38 = arith.constant 1.000000e+00 : f32
      %64 = vector.broadcast %cst_38 : f32 to vector<8x1xf32>
      %65 = arith.minimumf %64, %63 : vector<8x1xf32>
      %cst_39 = arith.constant 9.990000e-01 : f32
      %66 = vector.broadcast %cst_39 : f32 to vector<8x1xf32>
      %67 = arith.minimumf %58, %66 : vector<8x1xf32>
      %cst_40 = arith.constant 0.223606795 : f32
      %68 = vector.broadcast %cst_40 : f32 to vector<8x1xf32>
      %69 = arith.mulf %68, %67 : vector<8x1xf32>
      %cst_41 = arith.constant 0.999998986 : f32
      %70 = vector.broadcast %cst_41 : f32 to vector<8x1xf32>
      %71 = arith.minimumf %69, %70 : vector<8x1xf32>
      %cst_42 = arith.constant 1.000000e+00 : f32
      %72 = vector.broadcast %cst_42 : f32 to vector<8x1xf32>
      %73 = arith.addf %72, %71 : vector<8x1xf32>
      %cst_43 = arith.constant 1.000000e+00 : f32
      %74 = vector.broadcast %cst_43 : f32 to vector<8x1xf32>
      %75 = arith.subf %74, %71 : vector<8x1xf32>
      %76 = arith.divf %73, %75 : vector<8x1xf32>
      %77 = math.log %76 : vector<8x1xf32>
      %cst_44 = arith.constant 5.000000e-01 : f32
      %78 = vector.broadcast %cst_44 : f32 to vector<8x1xf32>
      %79 = arith.mulf %78, %77 : vector<8x1xf32>
      %cst_45 = arith.constant 9.99999997E-7 : f32
      %80 = vector.broadcast %cst_45 : f32 to vector<8x1xf32>
      %81 = arith.maximumf %67, %80 : vector<8x1xf32>
      %cst_46 = arith.constant 0.223606795 : f32
      %82 = vector.broadcast %cst_46 : f32 to vector<8x1xf32>
      %83 = arith.mulf %82, %81 : vector<8x1xf32>
      %84 = tpu.reciprocal %83 {approx = true} : vector<8x1xf32> -> vector<8x1xf32>
      %85 = arith.mulf %79, %84 : vector<8x1xf32>
      %86 = arith.mulf %56, %65 : vector<8x1xf32>
      %87 = arith.mulf %86, %85 : vector<8x1xf32>
      %88 = vector.broadcast %87 : vector<8x1xf32> to vector<8x128xf32>
      %89 = arith.mulf %43, %88 : vector<8x128xf32>
      %cst_47 = arith.constant 0.000000e+00 : f32
      %90 = vector.broadcast %cst_47 : f32 to vector<8x128xf32>
      %91 = arith.maximumf %89, %90 : vector<8x128xf32>
      %92 = arith.truncf %91 : vector<8x128xf32> to vector<8x128xbf16>
      %c0_48 = arith.constant 0 : index
      %c0_49 = arith.constant 0 : index
      %93 = vector.load %arg11[%c0_48, %c0_49] : memref<128x128xbf16, #tpu.memory_space<vmem>>, vector<128x128xbf16>
      %cst_50 = arith.constant dense<0.000000e+00> : vector<8x128xf32>
      %94 = tpu.matmul %92, %93, %cst_50 {dimension_numbers = #tpu.dot_dimension_numbers<[1], [0], [0], [1], [0, 0, 1, 1], [], []>} : vector<8x128xbf16>, vector<128x128xbf16>, vector<8x128xf32> -> vector<8x128xf32>
      %c0_51 = arith.constant 0 : index
      %c0_52 = arith.constant 0 : index
      %95 = vector.load %arg12[%c0_51, %c0_52] : memref<1x128xf32, #tpu.memory_space<vmem>>, vector<1x128xf32>
      %96 = vector.broadcast %95 : vector<1x128xf32> to vector<8x128xf32>
      %97 = arith.addf %94, %96 : vector<8x128xf32>
      %98 = arith.mulf %97, %97 : vector<8x128xf32>
      %cst_53 = arith.constant dense<0.000000e+00> : vector<8xf32>
      %99 = vector.multi_reduction <add>, %98, %cst_53 [1] : vector<8x128xf32> to vector<8xf32>
      %100 = vector.shape_cast %99 : vector<8xf32> to vector<8x1xf32>
      %101 = math.sqrt %100 : vector<8x1xf32>
      %cst_54 = arith.constant 0.223606795 : f32
      %102 = vector.broadcast %cst_54 : f32 to vector<8x1xf32>
      %103 = arith.mulf %102, %101 : vector<8x1xf32>
      %104 = math.tanh %103 : vector<8x1xf32>
      %cst_55 = arith.constant 9.99999997E-7 : f32
      %105 = vector.broadcast %cst_55 : f32 to vector<8x1xf32>
      %106 = arith.maximumf %101, %105 : vector<8x1xf32>
      %cst_56 = arith.constant 0.223606795 : f32
      %107 = vector.broadcast %cst_56 : f32 to vector<8x1xf32>
      %108 = arith.mulf %107, %106 : vector<8x1xf32>
      %109 = tpu.reciprocal %108 {approx = true} : vector<8x1xf32> -> vector<8x1xf32>
      %110 = arith.mulf %104, %109 : vector<8x1xf32>
      %cst_57 = arith.constant 4.47213602 : f32
      %111 = vector.broadcast %cst_57 : f32 to vector<8x1xf32>
      %112 = arith.mulf %104, %111 : vector<8x1xf32>
      %cst_58 = arith.constant 9.99999997E-7 : f32
      %113 = vector.broadcast %cst_58 : f32 to vector<8x1xf32>
      %114 = arith.maximumf %112, %113 : vector<8x1xf32>
      %115 = tpu.reciprocal %114 {approx = true} : vector<8x1xf32> -> vector<8x1xf32>
      %cst_59 = arith.constant 9.990000e-01 : f32
      %116 = vector.broadcast %cst_59 : f32 to vector<8x1xf32>
      %117 = arith.mulf %116, %115 : vector<8x1xf32>
      %cst_60 = arith.constant 1.000000e+00 : f32
      %118 = vector.broadcast %cst_60 : f32 to vector<8x1xf32>
      %119 = arith.minimumf %118, %117 : vector<8x1xf32>
      %cst_61 = arith.constant 9.990000e-01 : f32
      %120 = vector.broadcast %cst_61 : f32 to vector<8x1xf32>
      %121 = arith.minimumf %112, %120 : vector<8x1xf32>
      %cst_62 = arith.constant 0.223606795 : f32
      %122 = vector.broadcast %cst_62 : f32 to vector<8x1xf32>
      %123 = arith.mulf %122, %121 : vector<8x1xf32>
      %cst_63 = arith.constant 0.999998986 : f32
      %124 = vector.broadcast %cst_63 : f32 to vector<8x1xf32>
      %125 = arith.minimumf %123, %124 : vector<8x1xf32>
      %cst_64 = arith.constant 1.000000e+00 : f32
      %126 = vector.broadcast %cst_64 : f32 to vector<8x1xf32>
      %127 = arith.addf %126, %125 : vector<8x1xf32>
      %cst_65 = arith.constant 1.000000e+00 : f32
      %128 = vector.broadcast %cst_65 : f32 to vector<8x1xf32>
      %129 = arith.subf %128, %125 : vector<8x1xf32>
      %130 = arith.divf %127, %129 : vector<8x1xf32>
      %131 = math.log %130 : vector<8x1xf32>
      %cst_66 = arith.constant 5.000000e-01 : f32
      %132 = vector.broadcast %cst_66 : f32 to vector<8x1xf32>
      %133 = arith.mulf %132, %131 : vector<8x1xf32>
      %cst_67 = arith.constant 9.99999997E-7 : f32
      %134 = vector.broadcast %cst_67 : f32 to vector<8x1xf32>
      %135 = arith.maximumf %121, %134 : vector<8x1xf32>
      %cst_68 = arith.constant 0.223606795 : f32
      %136 = vector.broadcast %cst_68 : f32 to vector<8x1xf32>
      %137 = arith.mulf %136, %135 : vector<8x1xf32>
      %138 = tpu.reciprocal %137 {approx = true} : vector<8x1xf32> -> vector<8x1xf32>
      %139 = arith.mulf %133, %138 : vector<8x1xf32>
      %140 = arith.mulf %110, %119 : vector<8x1xf32>
      %141 = arith.mulf %140, %139 : vector<8x1xf32>
      %142 = vector.broadcast %141 : vector<8x1xf32> to vector<8x128xf32>
      %143 = arith.mulf %97, %142 : vector<8x128xf32>
      %c0_69 = arith.constant 0 : index
      %c0_70 = arith.constant 0 : index
      %144 = vector.load %arg13[%c0_69, %c0_70] : memref<8x128xf32, #tpu.memory_space<vmem>>, vector<8x128xf32>
      tpu.vector_store %arg13[%c0_69, %c0_70], %143 {strides = array<i32>} : memref<8x128xf32, #tpu.memory_space<vmem>>, vector<8x128xf32>,
    } else {
    }
    return
  }
  func.func @transform_0(%arg0: i32, %arg1: i32) -> (i32, i32) {
    %c0_i32 = arith.constant 0 : i32
    return %arg0, %arg1 : i32, i32
  }
  func.func @transform_1(%arg0: i32, %arg1: i32) -> (i32, i32) {
    %c0_i32 = arith.constant 0 : i32
    %c0_i32_0 = arith.constant 0 : i32
    return %arg1, %c0_i32 : i32, i32
  }
  func.func @transform_2(%arg0: i32, %arg1: i32) -> (i32, i32) {
    %c0_i32 = arith.constant 0 : i32
    %c0_i32_0 = arith.constant 0 : i32
    %c0_i32_1 = arith.constant 0 : i32
    return %c0_i32, %c0_i32_0 : i32, i32
  }
  func.func @transform_3(%arg0: i32, %arg1: i32) -> (i32, i32) {
    %c0_i32 = arith.constant 0 : i32
    %c0_i32_0 = arith.constant 0 : i32
    %c0_i32_1 = arith.constant 0 : i32
    return %c0_i32, %c0_i32_0 : i32, i32
  }
  func.func @transform_4(%arg0: i32, %arg1: i32) -> (i32, i32) {
    %c0_i32 = arith.constant 0 : i32
    %c0_i32_0 = arith.constant 0 : i32
    %c0_i32_1 = arith.constant 0 : i32
    return %c0_i32, %c0_i32_0 : i32, i32
  }
  func.func @transform_5(%arg0: i32, %arg1: i32) -> (i32, i32) {
    %c0_i32 = arith.constant 0 : i32
    %c0_i32_0 = arith.constant 0 : i32
    %c0_i32_1 = arith.constant 0 : i32
    return %c0_i32, %c0_i32_0 : i32, i32
  }
  func.func @transform_6(%arg0: i32, %arg1: i32) -> (i32, i32) {
    %c0_i32 = arith.constant 0 : i32
    %c0_i32_0 = arith.constant 0 : i32
    %c0_i32_1 = arith.constant 0 : i32
    return %c0_i32, %c0_i32_0 : i32, i32
  }
  func.func @transform_7(%arg0: i32, %arg1: i32) -> (i32, i32) {
    %c0_i32 = arith.constant 0 : i32
    %c0_i32_0 = arith.constant 0 : i32
    %c0_i32_1 = arith.constant 0 : i32
    return %c0_i32, %c0_i32_0 : i32, i32
  }
  func.func @transform_8(%arg0: i32, %arg1: i32) -> (i32, i32) {
    %c0_i32 = arith.constant 0 : i32
    %c0_i32_0 = arith.constant 0 : i32
    %c0_i32_1 = arith.constant 0 : i32
    return %c0_i32, %c0_i32_0 : i32, i32
  }
  func.func @transform_9(%arg0: i32, %arg1: i32) -> (i32, i32) {
    %c0_i32 = arith.constant 0 : i32
    %c0_i32_0 = arith.constant 0 : i32
    %c0_i32_1 = arith.constant 0 : i32
    return %c0_i32, %c0_i32_0 : i32, i32
  }
  func.func @transform_10(%arg0: i32, %arg1: i32) -> (i32, i32) {
    %c0_i32 = arith.constant 0 : i32
    %c0_i32_0 = arith.constant 0 : i32
    %c0_i32_1 = arith.constant 0 : i32
    return %c0_i32, %c0_i32_0 : i32, i32
  }
  func.func @transform_11(%arg0: i32, %arg1: i32) -> (i32, i32) {
    %c0_i32 = arith.constant 0 : i32
    %c0_i32_0 = arith.constant 0 : i32
    return %arg0, %c0_i32 : i32, i32
  }
}

</mosaic_0001>

<bundles_post_ra>
// kernel: tpu_custom_call.1
= control target key start
LH: loop header
LB: loop body
LE: loop exit
PB: predicated region body
PF: predicated region fallthrough
CT: control target
= control target key end

     0   :  { %s2657_s0 = inlined_call_operand.hbm [shape: bf16[8,1024], index: 0, kind: input, shape index: {}]   ;;  %s2658_s1 = inlined_call_operand.hbm [shape: bf16[1024,128], index: 1, kind: input, shape index: {}]   ;;  %s2659_s2 = inlined_call_operand.vmem [shape: f32[1,128], index: 2, kind: input, shape index: {}]   ;;  %s2660_s3 = inlined_call_operand.hbm [shape: bf16[128,128], index: 3, kind: input, shape index: {}]   ;;  %s2661_s4 = inlined_call_operand.vmem [shape: f32[1,128], index: 4, kind: input, shape index: {}]   ;;  %s2662_s5 = inlined_call_operand.hbm [shape: bf16[128,128], index: 5, kind: input, shape index: {}]   ;;  %s2663_s6 = inlined_call_operand.vmem [shape: f32[1,128], index: 6, kind: input, shape index: {}]   ;;  %s2664_s7 = inlined_call_operand.hbm [shape: bf16[128,128], index: 7, kind: input, shape index: {}]   ;;  %s2665_s8 = inlined_call_operand.vmem [shape: f32[1,128], index: 8, kind: input, shape index: {}]   ;;  %s2666_s9 = inlined_call_operand.hbm [shape: bf16[128,128], index: 9, kind: input, shape index: {}]   ;;  %s2667_s10 = inlined_call_operand.vmem [shape: f32[1,128], index: 10, kind: input, shape index: {}]   ;;  %s2668_s11 = inlined_call_operand.hbm [shape: f32[8,128], index: 11, kind: output, shape index: {}]  }
   0x1   :  { %2673 = sst [smem:[#allocation24_spill]] %s2657_s0 }
   0x2   :  { %2674 = sst [smem:[#allocation25_spill]] %s2660_s3 }
   0x3   :  { %2675 = sst [smem:[#allocation26_spill]] %s2662_s5 }
   0x4   :  { %2676 = sst [smem:[#allocation27_spill]] %s2664_s7 }
   0x5   :  { %2677 = sst [smem:[#allocation28_spill]] %s2666_s9 }
   0x6   :  { %16 = vsyncpa [#allocation4], 0 }
   0x7   :  { %18 = vsyncpa [#allocation4 + $0x1], 0 }
   0x8   :  { %19 = vsyncpa [#allocation7], 0 }
   0x9   :  { %21 = vsyncpa [#allocation7 + $0x1], 0 }
   0xa   :  { %22 = vsyncpa [#allocation10], 0 }
   0xb   :  { %23 = vsyncpa [#allocation13], 0 }
   0xc   :  { %24 = vsyncpa [#allocation5], 0  ;;  %s2353_s17 = smov 0   ;;  %s2355_s18 = smov 0  }
   0xd   :  { %s2357_s19 = smov 0   ;;  %s2359_s20 = smov 0  }
   0xe   :  { %s2361_s21 = smov 0   ;;  %s2363_s22 = smov 0  }
   0xf LB: > { %2678 = sst [smem:[#allocation21_spill]] %s2275_s21  ;;  %s2384_s23 = sadd.s32 4294967295, %s2279_s22   ;;  %s2279_s22 = sphi %s2363_s22, %s30_s22   ;;  %s2275_s21 = sphi %s2361_s21, %s2695_s21   ;;  %s2271_s20 = sphi %s2359_s20, %s2694_s20   ;;  %s2267_s19 = sphi %s2357_s19, %s2698_s19   ;;  %s2263_s18 = sphi %s2355_s18, %s2697_s18   ;;  %s2259_s17 = sphi %s2353_s17, %s2696_s17  }
  0x10   : > { %p1554_p0 = scmp.ge.s32.totalorder %s2279_s22, 1  ;;  %p65_p1 = scmp.eq.s32.totalorder %s2384_s23, 0 }
  0x11   : > { %p316_p2 = scmp.lt.s32.totalorder %s2279_s22, 3  ;;  %s2281_s25 = smov [#allocation8]  }
  0x12   : > { %s331_s26 = sshll.u32 %s2281_s25, 4  ;;  %s2282_s28 = smov [#allocation9]   ;;  %s332_s26 = int_to_ptr.vmem [resolvable:$true] %s331_s26 }
  0x13   : > { %p2389_p3 = pnand %p1554_p0, %p316_p2  ;;  %s347_s29 = sshll.u32 %s2282_s28, 4  ;;  %s348_s29 = int_to_ptr.vmem [resolvable:$true] %s347_s29 }
  0x14   : > { %s2283_s30 = smov [#allocation11]   ;;  %s2036_s13 = scalar_lea.vmem %s332_s26, 1024 }
  0x15   : > { %p1838_p4 = pneg %p2389_p3  ;;  %s363_s12 = sshll.u32 %s2283_s30, 4  ;;  %s364_s12 = int_to_ptr.vmem [resolvable:$true] %s363_s12 }
  0x16   : > { %p2037_p7 = scmp.ne.s32.totalorder %s332_s26, %s2036_s13  ;;  %p2044_p10 = scmp.lt.s32.totalorder %s332_s26, %s332_s26 }
  0x17   : > { %p2397_p5 = pnand %p1838_p4, %p65_p1  ;;  %p2045_p11 = scmp.lt.s32.totalorder %s2036_s13, %s2036_s13 }
  0x19   : > { %p2027_p6 = pneg %p2397_p5  ;;  %p2046_p12 = por %p2045_p11, %p2044_p10 }
  0x1b   : > { %p2039_p8 = pnand %p2037_p7, %p2027_p6 }
  0x1d   : > { %p2040_p9 = pneg %p2039_p8 }
  0x1f   : > { %p2047_p13 = pnand %p2046_p12, %p2040_p9 }
  0x21   : > { %2050 = shalt.err (!%p2047_p13)
}
  0x22   : > { %s2669_s14 = smov 64   ;;  %s2670_s15 = smov 4  }
  0x23   : > { %s2681_s3 = sld [smem:[#allocation25_spill]]  ;;  %s2062_s28 = scalar_lea.vmem %s348_s29, 1024 }
  0x24   : > { %p2063_p0 = scmp.ne.s32.totalorder %s348_s29, %s2062_s28  ;;  %p2070_p7 = scmp.lt.s32.totalorder %s348_s29, %s348_s29 }
  0x25   : > { %p2071_p8 = scmp.lt.s32.totalorder %s2062_s28, %s2062_s28 }
  0x26   : > { %p2065_p2 = pnand %p2063_p0, %p2027_p6 }
  0x27   : > { %p2072_p9 = por %p2071_p8, %p2070_p7 }
  0x28   : > { %p2066_p4 = pneg %p2065_p2 }
  0x29   : > { %1841 = dma.hbm_to_vmem [thread:$0]  (!%p2397_p5), %s2681_s3, 1024, %s332_s26, [#allocation7], %s2669_s14, %s2669_s14, %s2670_s15  }
  0x2a   : > { %p2073_p10 = pnand %p2072_p9, %p2066_p4 }
  0x2c   : > { %2076 = shalt.err (!%p2073_p10)
}
  0x2d   : > { %s2682_s5 = sld [smem:[#allocation26_spill]]  ;;  %s2088_s26 = scalar_lea.vmem %s364_s12, 1024 }
  0x2e   : > { %p2089_p11 = scmp.ne.s32.totalorder %s364_s12, %s2088_s26  ;;  %p2096_p0 = scmp.lt.s32.totalorder %s364_s12, %s364_s12 }
  0x2f   : > { %p2097_p2 = scmp.lt.s32.totalorder %s2088_s26, %s2088_s26 }
  0x30   : > { %p2091_p12 = pnand %p2089_p11, %p2027_p6 }
  0x31   : > { %p2098_p4 = por %p2097_p2, %p2096_p0 }
  0x32   : > { %p2092_p13 = pneg %p2091_p12 }
  0x33   : > { %1844 = dma.hbm_to_vmem [thread:$0]  (!%p2397_p5), %s2682_s5, 1024, %s348_s29, [#allocation10], %s2669_s14, %s2669_s14, %s2670_s15  }
  0x34   : > { %p2099_p7 = pnand %p2098_p4, %p2092_p13 }
  0x36   : > { %2102 = shalt.err (!%p2099_p7)
}
  0x37   : > { %s2683_s7 = sld [smem:[#allocation27_spill]]  ;;  %s2286_s29 = smov [#allocation12]  }
  0x38   : > { %s379_s28 = sshll.u32 %s2286_s29, 4  ;;  %s380_s28 = int_to_ptr.vmem [resolvable:$true] %s379_s28 }
  0x39   : > { %s2114_s30 = scalar_lea.vmem %s380_s28, 1024  ;;  %p2122_p11 = scmp.lt.s32.totalorder %s380_s28, %s380_s28 }
  0x3a   : > { %p2115_p8 = scmp.ne.s32.totalorder %s380_s28, %s2114_s30  ;;  %p2123_p12 = scmp.lt.s32.totalorder %s2114_s30, %s2114_s30 }
  0x3c   : > { %p2117_p9 = pnand %p2115_p8, %p2027_p6  ;;  %p2124_p13 = por %p2123_p12, %p2122_p11 }
  0x3d   : > { %1847 = dma.hbm_to_vmem [thread:$0]  (!%p2397_p5), %s2683_s7, 1024, %s364_s12, [#allocation10], %s2669_s14, %s2669_s14, %s2670_s15  }
  0x3e   : > { %p2118_p10 = pneg %p2117_p9 }
  0x40   : > { %p2125_p0 = pnand %p2124_p13, %p2118_p10 }
  0x42   : > { %2128 = shalt.err (!%p2125_p0)
}
  0x43   : > { %s2684_s9 = sld [smem:[#allocation28_spill]]  ;;  %s39_s27 = sadd.s32 1, %s2275_s21 }
  0x44   : > { %s51_s26 = sadd.s32 1, %s2267_s19  ;;  %p40_p6 = scmp.ge.s32.totalorder %s39_s27, 2 }
  0x45   : > { %p58_p2 = scmp.ne.s32.totalorder %s2267_s19, %s2263_s18  ;;  %p59_p4 = scmp.eq.s32.totalorder %s2279_s22, 0 }
  0x46   : > { %p64_p7 = scmp.ne.s32.totalorder %s2263_s18, %s2259_s17  ;;  %s2700_s27 = smov (%p40_p6, %s39_s27), 0 }
  0x47   : > { %2685 = sst [smem:[#allocation22_spill]] %s2700_s27  ;;  %p2456_p8 = por %p59_p4, %p58_p2 }
  0x48   : > { %p2462_p9 = por %p65_p1, %p64_p7  ;;  %s47_s29 = ssub.s32 %s2275_s21, %s2700_s27 }
  0x49   : > { %1850 = dma.hbm_to_vmem [thread:$0]  (!%p2397_p5), %s2684_s9, 1024, %s380_s28, [#allocation13], %s2669_s14, %s2669_s14, %s2670_s15  }
  0x4a   : > { %p1862_p5 = scmp.lt.s32.totalorder %s2279_s22, 2  ;;  %p49_p10 = scmp.eq.s32.totalorder %s47_s29, 0 }
  0x4b   : > { %s396_s28 = sand.u32 1, %s2267_s19   ;;  %s1652_s12 = sshll.u32 %s2275_s21, 8 }
  0x4c   : > { %s1560_s30 = sshll.u32 %s396_s28, 4  ;;  %s2689_s0 = sld [smem:[#allocation24_spill]] }
  0x4d   : > { %s2471_s17 = scalar_select %p49_p10, %s2267_s19, %s51_s26  }
  0x4e   : > { %s400_s3 = scalar_lea.vmem [#allocation3], %s1560_s30  ;;  %p2479_p11 = pnand %p1862_p5, %p2456_p8 }
  0x4f   : > { %2688 = sst [smem:[#allocation23_spill]] %s2471_s17  ;;  %s410_s5 = sshll.u32 %s400_s3, 4  ;;  %s411_s5 = int_to_ptr.vmem [resolvable:$true] %s410_s5 }
  0x50   : > { %s1563_s29 = sshll.u32 %s396_s28, 8  ;;  %s1653_s9 = sshll.u32 %s2275_s21, 12 }
  0x51   : > { %s397_s27 = scalar_lea.sflag [#allocation4], %s396_s28  ;;  %p2131_p12 = pneg %p2479_p11 }
  0x52   : > { %s408_s15 = scalar_lea.hbm %s2689_s0, %s1652_s12  ;;  %s2142_s26 = scalar_lea.vmem %s411_s5, 256 }
  0x53   : > { %p2143_p13 = scmp.ne.s32.totalorder %s411_s5, %s2142_s26  ;;  %s2287_s3 = smov [#allocation3]  }
  0x54   : > { %s2147_s14 = sshll.u32 %s2287_s3, 4  ;;  %s2148_s14 = int_to_ptr.vmem [resolvable:$false] %s2147_s14 }
  0x55   : > { %p2145_p0 = pnand %p2143_p13, %p2131_p12  ;;  %s2149_s16 = scalar_lea.vmem %s2148_s14, 512 }
  0x56   : > { %p2150_p2 = scmp.lt.s32.totalorder %s411_s5, %s2148_s14  ;;  %p2151_p4 = scmp.lt.s32.totalorder %s2149_s16, %s2142_s26 }
  0x57   : > { %p2146_p6 = pneg %p2145_p0 }
  0x58   : > { %p2152_p7 = por %p2151_p4, %p2150_p2 }
  0x5a   : > { %p2153_p8 = pnand %p2152_p7, %p2146_p6 }
  0x5c   : > { %2156 = shalt.err (!%p2153_p8)
}
  0x5d   : > { %1854 = dma.hbm_to_vmem [thread:$0]  (!%p2479_p11), %s408_s15, 256, %s411_s5, %s397_s27  }
  0x5e   : > { %s421_s28 = scalar_lea.vmem [#allocation6], %s1563_s29  ;;  %s417_s12 = sand.u32 1, %s2279_s22  }
  0x5f   : > { %s428_s30 = sshll.u32 %s421_s28, 4  ;;  %s427_s3 = scalar_lea.hbm %s2658_s1, %s1653_s9  ;;  %s429_s30 = int_to_ptr.vmem [resolvable:$true] %s428_s30 }
  0x60   : > { %s418_s21 = scalar_lea.sflag [#allocation7], %s417_s12  ;;  %s2170_s17 = scalar_lea.vmem %s429_s30, 4096 }
  0x61   : > { %p2171_p5 = scmp.ne.s32.totalorder %s429_s30, %s2170_s17  ;;  %s2288_s26 = smov [#allocation6]  }
  0x62   : > { %s2175_s14 = sshll.u32 %s2288_s26, 4  ;;  %s2176_s14 = int_to_ptr.vmem [resolvable:$false] %s2175_s14 }
  0x63   : > { %p2173_p10 = pnand %p2171_p5, %p2131_p12  ;;  %s2177_s16 = scalar_lea.vmem %s2176_s14, 8192 }
  0x64   : > { %p2178_p0 = scmp.lt.s32.totalorder %s429_s30, %s2176_s14  ;;  %p2179_p6 = scmp.lt.s32.totalorder %s2177_s16, %s2170_s17 }
  0x65   : > { %p2174_p13 = pneg %p2173_p10 }
  0x66   : > { %p2180_p2 = por %p2179_p6, %p2178_p0 }
  0x68   : > { %p2181_p4 = pnand %p2180_p2, %p2174_p13 }
  0x6a   : > { %2184 = shalt.err (!%p2181_p4)
}
  0x6b   : > { %s2691_s0 = smov 4   ;;  %s2692_s5 = smov 64  }
  0x6c   : > { %1857 = dma.hbm_to_vmem [thread:$0]  (!%p2479_p11), %s427_s3, 4096, %s429_s30, %s418_s21, %s2692_s5, %s2692_s5, %s2691_s0  }
  0x6d   : > { %440 = sbr.rel (%p2389_p3) target bundleno = 1815 (0x717), region = 64  ;;  %s442_s9 = sand.u32 (!%p2389_p3), 1, %s2263_s18  }
  0x6e   : > { %s1567_s15 = sshll.u32 (!%p2389_p3), %s442_s9, 4  ;;  %s443_s27 = scalar_lea.sflag (!%p2389_p3), [#allocation4], %s442_s9 }
  0x6f   : > { %s2506_s29 = scalar_lea.vmem (!%p2389_p3), [#allocation3], %s1567_s15 }
  0x72   : > { %2234 = dma.done.wait (%p2462_p9), %s443_s27, 256  }
  0x73   : > { %2236 = vsyncadd (%p2462_p9), %s443_s27, 4294967040  ;;  %s451_s7 = sand.u32 1, %s2384_s23   ;;  %s1568_s17 = sshll.u32 %s442_s9, 8 }
  0x74   : > { %s452_s21 = scalar_lea.sflag [#allocation7], %s451_s7  ;;  %s2513_s28 = scalar_lea.vmem [#allocation6], %s1568_s17 }
  0x75   : > { %2238 = dma.done.wait (%p2462_p9), %s452_s21, 4096  }
  0x76   : > { %2240 = vsyncadd (%p2462_p9), %s452_s21, 4294963200 }
  0x77   : > { %2242 = dma.done.wait (%p65_p1), [#allocation7], 1024  }
  0x78   : > { %2244 = vsyncadd (%p65_p1), [#allocation7], 4294966272 }
  0x79   : > { %2246 = dma.done.wait (%p65_p1), [#allocation10], 2048  }
  0x7a   : > { %2248 = vsyncadd (%p65_p1), [#allocation10], 4294965248 }
  0x7b   : > { %2250 = dma.done.wait (%p65_p1), [#allocation13], 1024  }
  0x7c   : > { %2252 = vsyncadd (%p65_p1), [#allocation13], 4294966272  ;;  %p1573_p3 = scmp.ne.s32.totalorder %s2271_s20, 0 }
  0x7e   : > { %516 = sbr.rel (%p1573_p3) target bundleno = 133 (0x85), region = 92 }
  0x83   : > { %v2289_v0 = vmov 0.0  }
  0x84   : > { %517 = vst [vmem:[#allocation2] sm:$0xff] %v2289_v0 }
  0x85 PF: > { %v1927_v1 = vld [vmem:[%s2513_s28 + $0x78] sm:$0xff]   ;;  %v1931_v5 = vld [vmem:[%s2513_s28 + $0x70] sm:$0xff]   ;;  %v1935_v9 = vld [vmem:[%s2513_s28 + $0x68] sm:$0xff]   ;;  %p1610_p1 = scmp.ne.s32.totalorder %s2271_s20, 1 }
  0x86   : > { %v1928_v2 = vld [vmem:[%s2513_s28 + $0xf8] sm:$0xff]   ;;  %1654 = vmatprep.subr.bf16.mxu0 %v1927_v1  ;;  %v1932_v6 = vld [vmem:[%s2513_s28 + $0xf0] sm:$0xff]   ;;  %v1936_v10 = vld [vmem:[%s2513_s28 + $0xe8] sm:$0xff]  }
  0x87   : > { %v1929_v3 = vld [vmem:[%s2513_s28 + $0x38] sm:$0xff]   ;;  %1676 = vmatprep.subr.bf16.mxu1 %v1928_v2  ;;  %v1933_v7 = vld [vmem:[%s2513_s28 + $0x30] sm:$0xff]   ;;  %v1937_v11 = vld [vmem:[%s2513_s28 + $0x28] sm:$0xff]  }
  0x88   : > { %v1930_v4 = vld [vmem:[%s2513_s28 + $0xb8] sm:$0xff]   ;;  %1655 = vmatpush3.bf16.msra.mxu0 %v1929_v3  ;;  %v1934_v8 = vld [vmem:[%s2513_s28 + $0xb0] sm:$0xff]   ;;  %v1938_v12 = vld [vmem:[%s2513_s28 + $0xa8] sm:$0xff]  }
  0x89   : > { %1677 = vmatpush3.bf16.msra.mxu1 %v1930_v4  ;;  %1656 = vmatprep.subr.bf16.mxu0 %v1931_v5  ;;  %v1939_v13 = vld [vmem:[%s2513_s28 + $0x60] sm:$0xff]   ;;  %v1943_v17 = vld [vmem:[%s2513_s28 + $0x58] sm:$0xff]   ;;  %v1947_v21 = vld [vmem:[%s2513_s28 + $0x50] sm:$0xff]  }
  0x8a   : > { %1678 = vmatprep.subr.bf16.mxu1 %v1932_v6  ;;  %v1940_v14 = vld [vmem:[%s2513_s28 + $0xe0] sm:$0xff]   ;;  %v1944_v18 = vld [vmem:[%s2513_s28 + $0xd8] sm:$0xff]   ;;  %v1948_v22 = vld [vmem:[%s2513_s28 + $0xd0] sm:$0xff]  }
  0x8b   : > { %v1941_v15 = vld [vmem:[%s2513_s28 + $0x20] sm:$0xff]   ;;  %v1945_v19 = vld [vmem:[%s2513_s28 + $0x18] sm:$0xff]   ;;  %v1949_v23 = vld [vmem:[%s2513_s28 + $0x10] sm:$0xff]  }
  0x8c   : > { %1657 = vmatpush3.bf16.msra.mxu0 %v1933_v7  ;;  %v1942_v16 = vld [vmem:[%s2513_s28 + $0xa0] sm:$0xff]   ;;  %v1946_v20 = vld [vmem:[%s2513_s28 + $0x98] sm:$0xff]   ;;  %v1950_v24 = vld [vmem:[%s2513_s28 + $0x90] sm:$0xff]  }
  0x8d   : > { %1679 = vmatpush3.bf16.msra.mxu1 %v1934_v8  ;;  %1658 = vmatprep.subr.bf16.mxu0 %v1935_v9  ;;  %v1951_v25 = vld [vmem:[%s2513_s28 + $0x48] sm:$0xff]   ;;  %v1955_v29 = vld [vmem:[%s2513_s28 + $0x40] sm:$0xff]   ;;  %v518_v45 = vld [vmem:[#allocation2] sm:$0xff] }
  0x8e   : > { %1680 = vmatprep.subr.bf16.mxu1 %v1936_v10  ;;  %v1952_v26 = vld [vmem:[%s2513_s28 + $0xc8] sm:$0xff]   ;;  %v1956_v30 = vld [vmem:[%s2513_s28 + $0xc0] sm:$0xff]  }
  0x8f   : > { %v1953_v27 = vld [vmem:[%s2513_s28 + $0x8] sm:$0xff]   ;;  %v1957_v31 = vld [vmem:[%s2513_s28] sm:$0xff]  }
  0x90   : > { %1659 = vmatpush3.bf16.msra.mxu0 %v1937_v11  ;;  %v1954_v28 = vld [vmem:[%s2513_s28 + $0x88] sm:$0xff]   ;;  %v1958_v32 = vld [vmem:[%s2513_s28 + $0x80] sm:$0xff]  }
  0x91   : > { %1681 = vmatpush3.bf16.msra.mxu1 %v1938_v12  ;;  %1660 = vmatprep.subr.bf16.mxu0 %v1939_v13  ;;  %v519_v33 = vld [vmem:[%s2506_s29] sm:$0xff]  ;;  %v520_v34 = vld [vmem:[%s2506_s29 + $0x8] sm:$0xff] }
  0x92   : > { %1682 = vmatprep.subr.bf16.mxu1 %v1940_v14  ;;  %v1574_v35 = vcombine.low %v519_v33, %v519_v33  ;;  %v1575_v36 = vcombine.high %v519_v33, %v519_v33  ;;  %v1576_v37 = vcombine.low %v520_v34, %v520_v34  ;;  %v1577_v38 = vcombine.high %v520_v34, %v520_v34 }
  0x94   : > { %1661 = vmatpush3.bf16.msra.mxu0 %v1941_v15  ;;  %823 = vmatprep.mubr.bf16.mxu0 %v1575_v36 }
  0x95   : > { %1683 = vmatpush3.bf16.msra.mxu1 %v1942_v16  ;;  %1662 = vmatprep.subr.bf16.mxu0 %v1943_v17 }
  0x96   : > { %1684 = vmatprep.subr.bf16.mxu1 %v1944_v18  ;;  %863 = vmatprep.mubr.bf16.mxu1 %v1577_v38 }
  0x98   : > { %1663 = vmatpush3.bf16.msra.mxu0 %v1945_v19 }
  0x99   : > { %1685 = vmatpush3.bf16.msra.mxu1 %v1946_v20  ;;  %1664 = vmatprep.subr.bf16.mxu0 %v1947_v21 }
  0x9a   : > { %1686 = vmatprep.subr.bf16.mxu1 %v1948_v22 }
  0x9c   : > { %1665 = vmatpush3.bf16.msra.mxu0 %v1949_v23 }
  0x9d   : > { %1687 = vmatpush3.bf16.msra.mxu1 %v1950_v24  ;;  %1666 = vmatprep.subr.bf16.mxu0 %v1951_v25 }
  0x9e   : > { %1688 = vmatprep.subr.bf16.mxu1 %v1952_v26 }
  0xa0   : > { %1667 = vmatpush3.bf16.msra.mxu0 %v1953_v27 }
  0xa1   : > { %1689 = vmatpush3.bf16.msra.mxu1 %v1954_v28  ;;  %1668 = vmatprep.subr.bf16.mxu0 %v1955_v29 }
  0xa2   : > { %1690 = vmatprep.subr.bf16.mxu1 %v1956_v30 }
  0xa4   : > { %1669 = vmatpush3.bf16.msra.mxu0 %v1957_v31 }
  0xa5   : > { %1691 = vmatpush3.bf16.msra.mxu1 %v1958_v32 }
  0xa7   : > { %824 = vmatmul.mubr.bf16.vlgmr.msra.gmra.mxu0 %v1574_v35 }
  0xa8   : > { %864 = vmatmul.mubr.bf16.vlgmr.msra.gmra.mxu1 %v1576_v37 }
 0x167   : > { %v1670_v39 = vpop.f32.mrf.mxu0 }
 0x168   : > { %v1692_v40 = vpop.f32.mrf.mxu1 }
 0x169   : > { %v1671_v41 = vpop.f32.mrf.mxu0 }
 0x16a   : > { %v1693_v42 = vpop.f32.mrf.mxu1  ;;  %v1672_v43 = vadd.f32 %v1671_v41, %v1670_v39 }
 0x16b   : > { %v1694_v44 = vadd.f32 %v1693_v42, %v1692_v40  ;;  %v1673_v46 = vpop.f32.mrf.mxu0 }
 0x16c   : > { %v1695_v47 = vpop.f32.mrf.mxu1 }
 0x16d   : > { %v866_v48 = vadd.f32 %v1694_v44, %v1672_v43  ;;  %v1674_v49 = vpop.f32.mrf.mxu0  ;;  %876 = sbr.rel (%p1610_p1) target bundleno = 1800 (0x708), region = 96 }
 0x16e   : > { %v1696_v50 = vpop.f32.mrf.mxu1 }
 0x16f   : > { %v871_v51 = vadd.f32 %v866_v48, %v518_v45 }
 0x171   : > { %872 = vst [vmem:[#allocation2] sm:$0xff] %v871_v51 }
 0x172   : > { %v1963_v52 = vld [vmem:[#allocation8 + $0x38] sm:$0xff]   ;;  %v2290_v53 = vmov 0.0   ;;  %v1964_v54 = vld [vmem:[#allocation8 + $0x30] sm:$0xff]   ;;  %vm2291_vm0 = vmmov 0   ;;  %v1965_v55 = vld [vmem:[#allocation8 + $0x28] sm:$0xff]  }
 0x173   : > { %1734 = vmatprep.subr.bf16.mxu0 %v2290_v53  ;;  %1754 = vmatprep.subr.bf16.mxu1 %v2290_v53  ;;  %v1971_v56 = vld [vmem:[#allocation9 + $0x38] sm:$0xff]   ;;  %v1966_v57 = vld [vmem:[#allocation8 + $0x20] sm:$0xff]   ;;  %v1972_v58 = vld [vmem:[#allocation9 + $0x30] sm:$0xff]  }
 0x174   : > { %1735 = vmatpush3.bf16.msra.mxu0 %v1963_v52  ;;  %1750 = vmatprep.mubr.msk.bf16.mxu0 %vm2291_vm0, %v2290_v53  ;;  %v1967_v59 = vld [vmem:[#allocation8 + $0x18] sm:$0xff]   ;;  %v1973_v60 = vld [vmem:[#allocation9 + $0x28] sm:$0xff]   ;;  %v1968_v61 = vld [vmem:[#allocation8 + $0x10] sm:$0xff]  }
 0x175   : > { %1736 = vmatprep.subr.bf16.mxu0 %v2290_v53  ;;  %1770 = vmatprep.mubr.msk.bf16.mxu1 %vm2291_vm0, %v2290_v53  ;;  %v1974_v62 = vld [vmem:[#allocation9 + $0x20] sm:$0xff]   ;;  %v1969_v63 = vld [vmem:[#allocation8 + $0x8] sm:$0xff]   ;;  %v1611_v1 = vld [vmem:[%s2659_s2] ss:$0 sm:$0xff] }
 0x176   : > { %1755 = vmatpush3.bf16.msra.mxu1 %v1971_v56  ;;  %v1975_v2 = vld [vmem:[#allocation9 + $0x18] sm:$0xff]   ;;  %v1970_v3 = vld [vmem:[#allocation8] sm:$0xff]   ;;  %v1976_v5 = vld [vmem:[#allocation9 + $0x10] sm:$0xff]  }
 0x177   : > { %1756 = vmatprep.subr.bf16.mxu1 %v2290_v53  ;;  %v1977_v7 = vld [vmem:[#allocation9 + $0x8] sm:$0xff]   ;;  %v1978_v8 = vld [vmem:[#allocation9] sm:$0xff]   ;;  %v1612_v9 = vld [vmem:[%s2661_s4] ss:$0 sm:$0xff] }
 0x178   : > { %1737 = vmatpush3.bf16.msra.mxu0 %v1964_v54  ;;  %v877_v0 = vld [vmem:[#allocation2] sm:$0xff]  ;;  %v1980_v18 = vld [vmem:[#allocation11 + $0x30] sm:$0xff]   ;;  %v1981_v19 = vld [vmem:[#allocation11 + $0x28] sm:$0xff]  }
 0x179   : > { %1738 = vmatprep.subr.bf16.mxu0 %v2290_v53  ;;  %v885_v4 = vadd.f32 %v1611_v1, %v877_v0  ;;  %v1979_v17 = vld [vmem:[#allocation11 + $0x38] sm:$0xff]   ;;  %v1982_v27 = vld [vmem:[#allocation11 + $0x20] sm:$0xff]   ;;  %v1984_v29 = vld [vmem:[#allocation11 + $0x10] sm:$0xff]  }
 0x17a   : > { %1757 = vmatpush3.bf16.msra.mxu1 %v1972_v58  ;;  %v1621_v20 = vld [vmem:[%s2663_s6] ss:$0 sm:$0xff]  ;;  %v1985_v30 = vld [vmem:[#allocation11 + $0x8] sm:$0xff]   ;;  %v1986_v31 = vld [vmem:[#allocation11] sm:$0xff]  }
 0x17b   : > { %1758 = vmatprep.subr.bf16.mxu1 %v2290_v53  ;;  %v886_v6 = vpack.c.bf16 %v885_v4, %v885_v4  ;;  %v1983_v28 = vld [vmem:[#allocation11 + $0x18] sm:$0xff]   ;;  %v1988_v45 = vld [vmem:[#allocation12 + $0x30] sm:$0xff]   ;;  %v1989_v46 = vld [vmem:[#allocation12 + $0x28] sm:$0xff]  }
 0x17c   : > { %1739 = vmatpush3.bf16.msra.mxu0 %v1965_v55  ;;  %v1630_v37 = vld [vmem:[%s2665_s8] ss:$0 sm:$0xff]  ;;  %v1990_v47 = vld [vmem:[#allocation12 + $0x20] sm:$0xff]   ;;  %v1992_v49 = vld [vmem:[#allocation12 + $0x10] sm:$0xff]  }
 0x17d   : > { %1740 = vmatprep.subr.bf16.mxu0 %v2290_v53  ;;  %v1987_v44 = vld [vmem:[#allocation12 + $0x38] sm:$0xff]   ;;  %v1993_v50 = vld [vmem:[#allocation12 + $0x8] sm:$0xff]   ;;  %v1994_v51 = vld [vmem:[#allocation12] sm:$0xff]  }
 0x17e   : > { %1759 = vmatpush3.bf16.msra.mxu1 %v1973_v60  ;;  %v1991_v48 = vld [vmem:[#allocation12 + $0x18] sm:$0xff]  }
 0x17f   : > { %1760 = vmatprep.subr.bf16.mxu1 %v2290_v53 }
 0x180   : > { %1741 = vmatpush3.bf16.msra.mxu0 %v1966_v57 }
 0x181   : > { %1742 = vmatprep.subr.bf16.mxu0 %v2290_v53 }
 0x182   : > { %1761 = vmatpush3.bf16.msra.mxu1 %v1974_v62 }
 0x183   : > { %1762 = vmatprep.subr.bf16.mxu1 %v2290_v53 }
 0x184   : > { %1743 = vmatpush3.bf16.msra.mxu0 %v1967_v59 }
 0x185   : > { %1744 = vmatprep.subr.bf16.mxu0 %v2290_v53 }
 0x186   : > { %1763 = vmatpush3.bf16.msra.mxu1 %v1975_v2 }
 0x187   : > { %1764 = vmatprep.subr.bf16.mxu1 %v2290_v53 }
 0x188   : > { %1745 = vmatpush3.bf16.msra.mxu0 %v1968_v61 }
 0x189   : > { %1746 = vmatprep.subr.bf16.mxu0 %v2290_v53 }
 0x18a   : > { %1765 = vmatpush3.bf16.msra.mxu1 %v1976_v5 }
 0x18b   : > { %1766 = vmatprep.subr.bf16.mxu1 %v2290_v53 }
 0x18c   : > { %1747 = vmatpush3.bf16.msra.mxu0 %v1969_v63 }
 0x18d   : > { %1748 = vmatprep.subr.bf16.mxu0 %v2290_v53 }
 0x18e   : > { %1767 = vmatpush3.bf16.msra.mxu1 %v1977_v7 }
 0x18f   : > { %1768 = vmatprep.subr.bf16.mxu1 %v2290_v53 }
 0x190   : > { %1749 = vmatpush3.bf16.msra.mxu0 %v1970_v3 }
 0x191   : > { %1774 = vmatprep.subr.bf16.mxu0 %v2290_v53 }
 0x192   : > { %1769 = vmatpush3.bf16.msra.mxu1 %v1978_v8 }
 0x193   : > { %1751 = vmatmul.mubr.bf16.vlgmr.msra.gmra.mxu0 %v886_v6  ;;  %1794 = vmatprep.subr.bf16.mxu1 %v2290_v53 }
 0x194   : > { %1790 = vmatprep.mubr.msk.bf16.mxu0 %vm2291_vm0, %v2290_v53  ;;  %1775 = vmatpush3.bf16.msra.mxu0 %v1979_v17 }
 0x195   : > { %1776 = vmatprep.subr.bf16.mxu0 %v2290_v53 }
 0x198   : > { %1777 = vmatpush3.bf16.msra.mxu0 %v1980_v18 }
 0x199   : > { %1778 = vmatprep.subr.bf16.mxu0 %v2290_v53 }
 0x19c   : > { %1779 = vmatpush3.bf16.msra.mxu0 %v1981_v19 }
 0x19d   : > { %1780 = vmatprep.subr.bf16.mxu0 %v2290_v53 }
 0x1a0   : > { %1781 = vmatpush3.bf16.msra.mxu0 %v1982_v27 }
 0x1a1   : > { %1782 = vmatprep.subr.bf16.mxu0 %v2290_v53 }
 0x1a4   : > { %1783 = vmatpush3.bf16.msra.mxu0 %v1983_v28 }
 0x1a5   : > { %1784 = vmatprep.subr.bf16.mxu0 %v2290_v53 }
 0x1a8   : > { %1785 = vmatpush3.bf16.msra.mxu0 %v1984_v29 }
 0x1a9   : > { %1786 = vmatprep.subr.bf16.mxu0 %v2290_v53 }
 0x1ac   : > { %1787 = vmatpush3.bf16.msra.mxu0 %v1985_v30 }
 0x1ad   : > { %1788 = vmatprep.subr.bf16.mxu0 %v2290_v53 }
 0x1b0   : > { %1789 = vmatpush3.bf16.msra.mxu0 %v1986_v31 }
 0x253   : > { %v992_v10 = vpop.f32.mrf.mxu0 }
 0x254   : > { %v993_v11 = vadd.f32 %v1612_v9, %v992_v10 }
 0x255   : > { %v1752_v12 = vpop.f32.mrf.mxu0 }
 0x256   : > { %v998_v13 = vmax.f32 %v993_v11, 0.0 }
 0x257   : > { %v995_v14 = vpop.f32.mrf.mxu0 }
 0x258   : > { %v999_v15 = vpack.c.bf16 %v998_v13, %v998_v13 }
 0x259   : > { %v1753_v16 = vpop.f32.mrf.mxu0 }
 0x25a   : > { %1771 = vmatmul.mubr.bf16.vlgmr.msra.gmra.mxu1 %v999_v15 }
 0x25b   : > { %1810 = vmatprep.mubr.msk.bf16.mxu1 %vm2291_vm0, %v2290_v53  ;;  %1795 = vmatpush3.bf16.msra.mxu1 %v1987_v44 }
 0x25c   : > { %1796 = vmatprep.subr.bf16.mxu1 %v2290_v53 }
 0x25f   : > { %1797 = vmatpush3.bf16.msra.mxu1 %v1988_v45 }
 0x260   : > { %1798 = vmatprep.subr.bf16.mxu1 %v2290_v53 }
 0x263   : > { %1799 = vmatpush3.bf16.msra.mxu1 %v1989_v46 }
 0x264   : > { %1800 = vmatprep.subr.bf16.mxu1 %v2290_v53 }
 0x267   : > { %1801 = vmatpush3.bf16.msra.mxu1 %v1990_v47 }
 0x268   : > { %1802 = vmatprep.subr.bf16.mxu1 %v2290_v53 }
 0x26b   : > { %1803 = vmatpush3.bf16.msra.mxu1 %v1991_v48 }
 0x26c   : > { %1804 = vmatprep.subr.bf16.mxu1 %v2290_v53 }
 0x26f   : > { %1805 = vmatpush3.bf16.msra.mxu1 %v1992_v49 }
 0x270   : > { %1806 = vmatprep.subr.bf16.mxu1 %v2290_v53 }
 0x273   : > { %1807 = vmatpush3.bf16.msra.mxu1 %v1993_v50 }
 0x274   : > { %1808 = vmatprep.subr.bf16.mxu1 %v2290_v53 }
 0x277   : > { %1809 = vmatpush3.bf16.msra.mxu1 %v1994_v51 }
 0x31a   : > { %v1105_v21 = vpop.f32.mrf.mxu1 }
 0x31b   : > { %v1106_v22 = vadd.f32 %v1621_v20, %v1105_v21 }
 0x31c   : > { %v1772_v23 = vpop.f32.mrf.mxu1 }
 0x31d   : > { %v1111_v24 = vmul.f32 %v1106_v22, %v1106_v22 }
 0x31e   : > { %v1108_v25 = vpop.f32.mrf.mxu1 }
 0x31f   : > { %1112 = vadd.xlane.f32.xlu0 %v1111_v24  ;;  %v1639_v24 = vld [vmem:[%s2667_s10] ss:$0 sm:$0xff] }
 0x320   : > { %v1773_v26 = vpop.f32.mrf.mxu1 }
 0x3a8   : > { %v1113_v32 = vpop.xlane.xlu0 %1112 }
 0x3a9   : > { %v1114_v33 = vmax.f32 %v1113_v32, 1e-24 }
 0x3ab   : > { %1995 = vrsqrt.f32 %v1114_v33 }
 0x3b8   : > { %v1996_v34 = vpop.eup %1995 }
 0x3b9   : > { %v1116_v35 = vmul.f32 %v1996_v34, %v1106_v22 }
 0x3bb   : > { %v1117_v36 = vpack.c.bf16 %v1116_v35, %v1116_v35 }
 0x3bd   : > { %1791 = vmatmul.mubr.bf16.vlgmr.msra.gmra.mxu0 %v1117_v36 }
 0x47d   : > { %v1223_v38 = vpop.f32.mrf.mxu0 }
 0x47e   : > { %v2612_v39 = vadd.f32 %v1630_v37, %v1223_v38 }
 0x47f   : > { %v1792_v40 = vpop.f32.mrf.mxu0 }
 0x480   : > { %v1229_v41 = vmul.f32 %v2612_v39, %v2612_v39 }
 0x481   : > { %v1226_v42 = vpop.f32.mrf.mxu0 }
 0x482   : > { %1230 = vadd.xlane.f32.xlu0 %v1229_v41 }
 0x483   : > { %v1793_v43 = vpop.f32.mrf.mxu0 }
 0x50b   : > { %v1231_v52 = vpop.xlane.xlu0 %1230 }
 0x50c   : > { %1997 = vrsqrt.f32 %v1231_v52  ;;  %vm1234_vm1 = vcmp.eq.f32.partialorder %v1231_v52, inf  ;;  %v1237_v56 = vand.u32 2147483648, %v1231_v52  ;;  %vm1236_vm2 = vcmp.eq.f32.partialorder %v1231_v52, 0.0 }
 0x519   : > { %v1998_v54 = vpop.eup %1997 }
 0x51a   : > { %v1233_v55 = vmul.f32 %v1998_v54, %v1231_v52 }
 0x51c   : > { %v1235_v57 = vsel %vm1234_vm1, %v1231_v52, %v1233_v55 }
 0x51d   : > { %v1238_v58 = vsel %vm1236_vm2, %v1237_v56, %v1235_v57 }
 0x51e   : > { %v1239_v59 = vmul.f32 0.2236068, %v1238_v58  ;;  %v1241_v2 = vmax.f32 %v1238_v58, 1e-06 }
 0x520   : > { %1999 = vtanh.f32 %v1239_v59  ;;  %v1242_v3 = vmul.f32 0.2236068, %v1241_v2 }
 0x52d   : > { %v2000_v60 = vpop.eup %1999 }
 0x52e   : > { %v1245_v61 = vmul.f32 4.472136, %v2000_v60 }
 0x530   : > { %v1250_v62 = vmin.f32 %v1245_v61, 0.999  ;;  %v1246_v53 = vmax.f32 %v1245_v61, 1e-06 }
 0x532   : > { %v1251_v63 = vmul.f32 0.2236068, %v1250_v62  ;;  %v1260_v5 = vmax.f32 %v1250_v62, 1e-06 }
 0x534   : > { %v1252_v0 = vmin.f32 %v1251_v63, 0.999999  ;;  %v1261_v8 = vmul.f32 0.2236068, %v1260_v5 }
 0x536   : > { %v1254_v1 = vsub.f32 1.0, %v1252_v0  ;;  %v1253_v4 = vadd.f32 1.0, %v1252_v0 }
 0x538   : > { %2001 = vrcp.f32 %v1254_v1 }
 0x539   : > { %2003 = vrcp.f32 %v1246_v53 }
 0x53a   : > { %2005 = vrcp.f32 %v1242_v3 }
 0x545   : > { %v2002_v6 = vpop.eup %2001 }
 0x546   : > { %v1256_v7 = vmul.f32 %v2002_v6, %v1253_v4  ;;  %v2004_v9 = vpop.eup %2003 }
 0x547   : > { %v1248_v10 = vmul.f32 0.999, %v2004_v9  ;;  %v2006_v11 = vpop.eup %2005 }
 0x548   : > { %2007 = vlog2.f32 %v1256_v7  ;;  %v1244_v15 = vmul.f32 %v2006_v11, %v2000_v60 }
 0x549   : > { %2009 = vrcp.f32 %v1261_v8  ;;  %v1249_v13 = vmin.f32 %v1248_v10, 1.0 }
 0x54b   : > { %v1264_v19 = vmul.f32 %v1249_v13, %v1244_v15 }
 0x555   : > { %v2008_v12 = vpop.eup %2007 }
 0x556   : > { %v1258_v14 = vmul.f32 0.6931472, %v2008_v12  ;;  %v2010_v17 = vpop.eup %2009 }
 0x558   : > { %v1259_v16 = vmul.f32 0.5, %v1258_v14 }
 0x55a   : > { %v1263_v18 = vmul.f32 %v2010_v17, %v1259_v16 }
 0x55c   : > { %v1265_v20 = vmul.f32 %v1264_v19, %v1263_v18 }
 0x55e   : > { %v1266_v21 = vmul.f32 %v1265_v20, %v2612_v39 }
 0x560   : > { %v1267_v22 = vmax.f32 %v1266_v21, 0.0 }
 0x562   : > { %v1268_v23 = vpack.c.bf16 %v1267_v22, %v1267_v22 }
 0x564   : > { %1811 = vmatmul.mubr.bf16.vlgmr.msra.gmra.mxu1 %v1268_v23 }
 0x624   : > { %v1374_v25 = vpop.f32.mrf.mxu1 }
 0x625   : > { %v1375_v26 = vadd.f32 %v1639_v24, %v1374_v25 }
 0x626   : > { %v1812_v27 = vpop.f32.mrf.mxu1 }
 0x627   : > { %v1380_v28 = vmul.f32 %v1375_v26, %v1375_v26 }
 0x628   : > { %v1377_v29 = vpop.f32.mrf.mxu1 }
 0x629   : > { %1381 = vadd.xlane.f32.xlu1 %v1380_v28 }
 0x62a   : > { %v1813_v30 = vpop.f32.mrf.mxu1 }
 0x6b2   : > { %v1382_v31 = vpop.xlane.xlu1 %1381 }
 0x6b3   : > { %2011 = vrsqrt.f32 %v1382_v31  ;;  %vm1385_vm3 = vcmp.eq.f32.partialorder %v1382_v31, inf  ;;  %v1388_v34 = vand.u32 2147483648, %v1382_v31  ;;  %vm1387_vm4 = vcmp.eq.f32.partialorder %v1382_v31, 0.0 }
 0x6c0   : > { %v2012_v32 = vpop.eup %2011 }
 0x6c1   : > { %v1384_v33 = vmul.f32 %v2012_v32, %v1382_v31 }
 0x6c3   : > { %v1386_v35 = vsel %vm1385_vm3, %v1382_v31, %v1384_v33 }
 0x6c4   : > { %v1389_v36 = vsel %vm1387_vm4, %v1388_v34, %v1386_v35 }
 0x6c5   : > { %v1390_v37 = vmul.f32 0.2236068, %v1389_v36  ;;  %v1392_v45 = vmax.f32 %v1389_v36, 1e-06 }
 0x6c7   : > { %2013 = vtanh.f32 %v1390_v37  ;;  %v1393_v46 = vmul.f32 0.2236068, %v1392_v45 }
 0x6d4   : > { %v2014_v38 = vpop.eup %2013 }
 0x6d5   : > { %v1396_v39 = vmul.f32 4.472136, %v2014_v38 }
 0x6d7   : > { %v1401_v40 = vmin.f32 %v1396_v39, 0.999  ;;  %v1397_v44 = vmax.f32 %v1396_v39, 1e-06 }
 0x6d9   : > { %v1402_v41 = vmul.f32 0.2236068, %v1401_v40  ;;  %v1411_v48 = vmax.f32 %v1401_v40, 1e-06 }
 0x6db   : > { %v1403_v42 = vmin.f32 %v1402_v41, 0.999999  ;;  %v1412_v51 = vmul.f32 0.2236068, %v1411_v48 }
 0x6dd   : > { %v1405_v43 = vsub.f32 1.0, %v1403_v42  ;;  %v1404_v47 = vadd.f32 1.0, %v1403_v42 }
 0x6df   : > { %2015 = vrcp.f32 %v1405_v43 }
 0x6e0   : > { %2017 = vrcp.f32 %v1397_v44 }
 0x6e1   : > { %2019 = vrcp.f32 %v1393_v46 }
 0x6ec   : > { %v2016_v49 = vpop.eup %2015 }
 0x6ed   : > { %v1407_v50 = vmul.f32 %v2016_v49, %v1404_v47  ;;  %v2018_v52 = vpop.eup %2017 }
 0x6ee   : > { %v1399_v54 = vmul.f32 0.999, %v2018_v52  ;;  %v2020_v55 = vpop.eup %2019 }
 0x6ef   : > { %2021 = vlog2.f32 %v1407_v50  ;;  %v1395_v59 = vmul.f32 %v2020_v55, %v2014_v38 }
 0x6f0   : > { %2023 = vrcp.f32 %v1412_v51  ;;  %v1400_v57 = vmin.f32 %v1399_v54, 1.0 }
 0x6f2   : > { %v1415_v63 = vmul.f32 %v1400_v57, %v1395_v59 }
 0x6fc   : > { %v2022_v56 = vpop.eup %2021 }
 0x6fd   : > { %v1409_v58 = vmul.f32 0.6931472, %v2022_v56  ;;  %v2024_v61 = vpop.eup %2023 }
 0x6ff   : > { %v1410_v60 = vmul.f32 0.5, %v1409_v58 }
 0x701   : > { %v1414_v62 = vmul.f32 %v2024_v61, %v1410_v60 }
 0x703   : > { %v1416_v0 = vmul.f32 %v1415_v63, %v1414_v62 }
 0x705   : > { %v1417_v1 = vmul.f32 %v1416_v0, %v1375_v26 }
 0x707   : > { %1418 = vst [vmem:[#allocation14] sm:$0xff] %v1417_v1 }
 0x708 PF: > { %p1867_p9 = scmp.eq.s32.totalorder %s2384_s23, 1  ;;  %s2292_s0 = smov [#allocation14]  }
 0x709   : > { %s1428_s5 = sshll.u32 %s2292_s0, 4  ;;  %s1429_s5 = int_to_ptr.vmem [resolvable:$true] %s1428_s5 }
 0x70a   : > { %s2185_s9 = scalar_lea.vmem %s1429_s5, 128  ;;  %p2192_p8 = scmp.lt.s32.totalorder %s1429_s5, %s1429_s5 }
 0x70b   : > { %p2186_p11 = scmp.ne.s32.totalorder %s1429_s5, %s2185_s9  ;;  %p2193_p5 = scmp.lt.s32.totalorder %s2185_s9, %s2185_s9 }
 0x70d   : > { %p2187_p12 = pnand %p2186_p11, %p1867_p9  ;;  %p2194_p10 = por %p2193_p5, %p2192_p8 }
 0x70f   : > { %p2188_p7 = pneg %p2187_p12 }
 0x711   : > { %p2195_p13 = pnand %p2194_p10, %p2188_p7 }
 0x713   : > { %2198 = shalt.err (!%p2195_p13)
}
 0x714   : > { %1835 = dma.vmem_to_hbm [thread:$0]  (%p1867_p9), %s1429_s5, 128, %s2668_s11, [#allocation5]  }
 0x715   : > { %2254 = dma.done.wait (%p1867_p9), [#allocation5], 128  }
 0x716   : > { %2256 = vsyncadd (%p1867_p9), [#allocation5], 4294967168 }
 0x717 PF: > { %s30_s22 = sadd.s32 1, %s2279_s22   ;;  %s2693_s29 = sld [smem:[#allocation23_spill]] }
 0x718   : > { %p27_p0 = scmp.ge.s32.totalorder %s30_s22, 4   ;;  %s2694_s20 = sld [smem:[#allocation21_spill]] }
 0x719   : > { %s2695_s21 = sld [smem:[#allocation22_spill]]  ;;  %s2696_s17 = smov %s2263_s18 }
 0x71a   : > { %s2697_s18 = smov %s2267_s19  ;;  %29 = sbr.rel (!%p27_p0) target bundleno = 15 (0xf), region = 139 }
 0x71d   : > { %s2698_s19 = smov %s2693_s29 }
 0x71f   :  { %1441 = vsyncpa [#allocation4], 1 }
 0x720   :  { %1443 = vsyncpa [#allocation4 + $0x1], 1 }
 0x721   :  { %1444 = vsyncpa [#allocation7], 1 }
 0x722   :  { %1446 = vsyncpa [#allocation7 + $0x1], 1 }
 0x723   :  { %1447 = vsyncpa [#allocation10], 1 }
 0x724   :  { %1448 = vsyncpa [#allocation13], 1 }
 0x725   :  { %1449 = vsyncpa [#allocation5], 1 }
 0x726   :  { %1451 = vsyncpa [#allocation5 + $0x1], 1 }

</bundles_post_ra>
